<compile_context>
chip_gen: v7x
topology: tpu7x:2x2x1
jax: 0.10.0
libtpu: 0.0.40
codegen_flags: <defaults>
</compile_context>

<pallas_src>
import jax
import jax.numpy as jnp
from jax.experimental import pallas as pl
from jax.experimental.pallas import tpu as pltpu


def _round_up(x, m):
    return (x + m - 1) // m * m


# ---------------------------------------------------------------------------
# Kernels
# ---------------------------------------------------------------------------

def _lm_head_kernel_single_k(x_ref, w_ref, b_ref, o_ref):
    """2-D grid: one (tm, tn) output tile, full H reduction in one MXU pass."""
    o_ref[...] = (
        jnp.dot(x_ref[...], w_ref[...], preferred_element_type=jnp.float32)
        + b_ref[...].astype(jnp.float32)
    ).astype(o_ref.dtype)


def _lm_head_kernel_k_split(x_ref, w_ref, b_ref, o_ref, acc_ref):
    """3-D grid fallback for very large H: k (reduction) is the last axis."""
    @pl.when(pl.program_id(2) == 0)
    def _():
        acc_ref[...] = jnp.zeros_like(acc_ref)

    acc_ref[...] += jnp.dot(
        x_ref[...], w_ref[...], preferred_element_type=jnp.float32
    )

    @pl.when(pl.program_id(2) == pl.num_programs(2) - 1)
    def _():
        o_ref[...] = (
            acc_ref[...] + b_ref[...].astype(jnp.float32)
        ).astype(o_ref.dtype)


# ---------------------------------------------------------------------------
# Planning / parameter preparation (done once, outside the forward path)
# ---------------------------------------------------------------------------

def _lm_head_plan(H, V, *, tn=1024, tk_max=2048):
    """Static tiling plan along the H (reduction) and V (vocab) axes."""
    tn_eff = min(tn, _round_up(V, 128))          # lane-dense output tile
    Vp = _round_up(V, tn_eff)
    Hp = _round_up(H, 128)
    if Hp <= tk_max:                             # BERT-scale H: single K step
        return tn_eff, Vp, Hp, Hp, True
    tk_eff = tk_max
    Kp = _round_up(H, tk_eff)
    return tn_eff, Vp, tk_eff, Kp, False


def prepare_lm_head_params(weight, bias, *, tn=1024, tk_max=2048):
    """One-time prep of the nn.Linear (V, H) weight / (V,) bias into the
    kernel's padded (Hp, Vp) / (1, Vp) layout.  Call at parameter-load time,
    NOT per forward call (the transpose+pad of a 30-50k-vocab weight is a
    large HBM copy)."""
    V, H = weight.shape
    _, Vp, _, Kp, _ = _lm_head_plan(H, V, tn=tn, tk_max=tk_max)
    w_hv = weight.T
    if (Kp, Vp) != (H, V):
        w_hv = jnp.pad(w_hv, ((0, Kp - H), (0, Vp - V)))
    bias_row = bias if Vp == V else jnp.pad(bias, (0, Vp - V))
    return w_hv, bias_row.reshape(1, Vp)


def _vmem_limit_bytes(tm, tn, tk, x_itemsize, w_itemsize, out_itemsize,
                      needs_acc):
    # Double-buffered inputs + double-buffered output (+ f32 accumulator).
    total = 2 * (tm * tk * x_itemsize + (tk + 1) * tn * w_itemsize)
    total += 2 * tm * tn * out_itemsize
    if needs_acc:
        total += tm * tn * 4
    total = int(total * 1.25) + (4 << 20)        # compiler-internal headroom
    # Floor above the v5e 16 MiB default; cap safely below v7x's 64 MiB VMEM.
    return max(32 << 20, min(total, 56 << 20))


# ---------------------------------------------------------------------------
# Forward
# ---------------------------------------------------------------------------

def bert_generation_lm_head_prepared(hidden_states, w_hv, bias_row, vocab_size,
                                     *, tm=512, tn=1024, tk_max=2048):
    """LM-head forward using pre-prepared (padded, transposed) weights.

    hidden_states: (..., H)
    w_hv:          (Hp, Vp)  from prepare_lm_head_params
    bias_row:      (1, Vp)   from prepare_lm_head_params
    returns:       (..., vocab_size) logits in hidden_states.dtype
    """
    *lead, H = hidden_states.shape
    V = vocab_size
    tn_eff, Vp, tk_eff, Kp, single_k = _lm_head_plan(H, V, tn=tn, tk_max=tk_max)
    assert w_hv.shape == (Kp, Vp), (w_hv.shape, (Kp, Vp))
    assert bias_row.shape == (1, Vp), (bias_row.shape, (1, Vp))

    x = hidden_states.reshape(-1, H)
    M = x.shape[0]
    tm_eff = min(tm, _round_up(M, 8))
    Mp = _round_up(M, tm_eff)

    # Skip padding entirely when the problem is already tile-aligned.
    if (Mp, Kp) != (M, H):
        x = jnp.pad(x, ((0, Mp - M), (0, Kp - H)))

    out_dtype = hidden_states.dtype
    vmem_limit = _vmem_limit_bytes(
        tm_eff, tn_eff, tk_eff,
        x.dtype.itemsize, w_hv.dtype.itemsize, jnp.dtype(out_dtype).itemsize,
        needs_acc=not single_k)

    if single_k:
        grid = (Mp // tm_eff, Vp // tn_eff)
        grid_spec = pltpu.PrefetchScalarGridSpec(
            num_scalar_prefetch=0,
            grid=grid,
            in_specs=[
                pl.BlockSpec((tm_eff, Kp), lambda i, j: (i, 0)),    # x
                pl.BlockSpec((Kp, tn_eff), lambda i, j: (0, j)),    # weight
                pl.BlockSpec((1, tn_eff), lambda i, j: (0, j)),     # bias
            ],
            out_specs=pl.BlockSpec((tm_eff, tn_eff), lambda i, j: (i, j)),
        )
        kernel = _lm_head_kernel_single_k
        dims = ("parallel", "parallel")
    else:
        grid = (Mp // tm_eff, Vp // tn_eff, Kp // tk_eff)
        grid_spec = pltpu.PrefetchScalarGridSpec(
            num_scalar_prefetch=0,
            grid=grid,
            in_specs=[
                pl.BlockSpec((tm_eff, tk_eff), lambda i, j, k: (i, k)),
                pl.BlockSpec((tk_eff, tn_eff), lambda i, j, k: (k, j)),
                pl.BlockSpec((1, tn_eff), lambda i, j, k: (0, j)),
            ],
            out_specs=pl.BlockSpec((tm_eff, tn_eff), lambda i, j, k: (i, j)),
            scratch_shapes=[pltpu.VMEM((tm_eff, tn_eff), jnp.float32)],
        )
        kernel = _lm_head_kernel_k_split
        dims = ("parallel", "parallel", "arbitrary")

    out_p = pl.pallas_call(
        kernel,
        out_shape=jax.ShapeDtypeStruct((Mp, Vp), out_dtype),
        grid_spec=grid_spec,
        compiler_params=pltpu.CompilerParams(
            dimension_semantics=dims,
            vmem_limit_bytes=vmem_limit),
    )(x, w_hv, bias_row)

    logits = out_p if (Mp == M and Vp == V) else out_p[:M, :V]
    return logits.reshape(*lead, V)


def bert_generation_lm_head(hidden_states, weight, bias,
                            *, tm=512, tn=1024, tk_max=2048):
    """Convenience one-shot wrapper taking the raw nn.Linear (V, H) weight.
    Prefer prepare_lm_head_params + bert_generation_lm_head_prepared so the
    weight transpose/pad is done once, not per call."""
    w_hv, bias_row = prepare_lm_head_params(weight, bias, tn=tn, tk_max=tk_max)
    return bert_generation_lm_head_prepared(
        hidden_states, w_hv, bias_row, weight.shape[0],
        tm=tm, tn=tn, tk_max=tk_max)


def _reference(hidden_states, weight, bias):
    return jnp.einsum("...h,vh->...v", hidden_states, weight) + bias


if __name__ == "__main__":
    # Small synthetic "config"
    hidden_size = 32
    vocab_size = 50
    B, S = 2, 8

    key = jax.random.PRNGKey(0)
    k_x, k_w, k_b = jax.random.split(key, 3)

    hidden_states = jax.random.normal(k_x, (B, S, hidden_size), jnp.float32)
    weight = 0.02 * jax.random.normal(k_w, (vocab_size, hidden_size), jnp.float32)
    bias = 0.1 * jax.random.normal(k_b, (vocab_size,), jnp.float32)

    # One-time weight preparation (hoisted out of the forward path).
    w_hv, bias_row = prepare_lm_head_params(weight, bias)

    fwd = jax.jit(bert_generation_lm_head_prepared, static_argnums=(3,))
    logits = fwd(hidden_states, w_hv, bias_row, vocab_size)
    logits = jax.block_until_ready(logits)

    ref = _reference(hidden_states, weight, bias)
    assert logits.shape == (B, S, vocab_size), logits.shape
    assert jnp.allclose(logits, ref, atol=1e-4, rtol=1e-4), "mismatch vs reference"

    print("KERNEL_OK")
</pallas_src>

<mosaic_0001>
module attributes {stable_mosaic.version = 11 : i64} {
  func.func @_lm_head_kernel_single_k(%arg0: i32, %arg1: i32, %arg2: memref<16x128xf32, #tpu.memory_space<vmem>>, %arg3: memref<128x128xf32, #tpu.memory_space<vmem>>, %arg4: memref<1x128xf32, #tpu.memory_space<vmem>>, %arg5: memref<16x128xf32, #tpu.memory_space<vmem>>) attributes {dimension_semantics = [#tpu.dimension_semantics<parallel>, #tpu.dimension_semantics<parallel>], iteration_bounds = array<i64: 1, 1>, scalar_prefetch = 0 : i64, scratch_operands = 0 : i64, tpu.core_type = #tpu.core_type<tc>, window_params = [{transform_indices = @transform_0, window_bounds = array<i64: 16, 128>}, {transform_indices = @transform_1, window_bounds = array<i64: 128, 128>}, {transform_indices = @transform_2, window_bounds = array<i64: 1, 128>}, {transform_indices = @transform_3, window_bounds = array<i64: 16, 128>}]} {
    %c0 = arith.constant 0 : index
    %c0_0 = arith.constant 0 : index
    %0 = vector.load %arg2[%c0, %c0_0] : memref<16x128xf32, #tpu.memory_space<vmem>>, vector<16x128xf32>
    %c0_1 = arith.constant 0 : index
    %c0_2 = arith.constant 0 : index
    %1 = vector.load %arg3[%c0_1, %c0_2] : memref<128x128xf32, #tpu.memory_space<vmem>>, vector<128x128xf32>
    %cst = arith.constant dense<0.000000e+00> : vector<16x128xf32>
    %2 = tpu.matmul %0, %1, %cst {dimension_numbers = #tpu.dot_dimension_numbers<[1], [0], [0], [1], [0, 0, 1, 1], [], []>} : vector<16x128xf32>, vector<128x128xf32>, vector<16x128xf32> -> vector<16x128xf32>
    %c0_3 = arith.constant 0 : index
    %c0_4 = arith.constant 0 : index
    %3 = vector.load %arg4[%c0_3, %c0_4] : memref<1x128xf32, #tpu.memory_space<vmem>>, vector<1x128xf32>
    %4 = vector.broadcast %3 : vector<1x128xf32> to vector<16x128xf32>
    %5 = arith.addf %2, %4 : vector<16x128xf32>
    %c0_5 = arith.constant 0 : index
    %c0_6 = arith.constant 0 : index
    %6 = vector.load %arg5[%c0_5, %c0_6] : memref<16x128xf32, #tpu.memory_space<vmem>>, vector<16x128xf32>
    tpu.vector_store %arg5[%c0_5, %c0_6], %5 {strides = array<i32>} : memref<16x128xf32, #tpu.memory_space<vmem>>, vector<16x128xf32>,
    return
  }
  func.func @transform_0(%arg0: i32, %arg1: i32) -> (i32, i32) {
    %c0_i32 = arith.constant 0 : i32
    %c0_i32_0 = arith.constant 0 : i32
    return %arg0, %c0_i32 : i32, i32
  }
  func.func @transform_1(%arg0: i32, %arg1: i32) -> (i32, i32) {
    %c0_i32 = arith.constant 0 : i32
    %c0_i32_0 = arith.constant 0 : i32
    return %c0_i32, %arg1 : i32, i32
  }
  func.func @transform_2(%arg0: i32, %arg1: i32) -> (i32, i32) {
    %c0_i32 = arith.constant 0 : i32
    %c0_i32_0 = arith.constant 0 : i32
    return %c0_i32, %arg1 : i32, i32
  }
  func.func @transform_3(%arg0: i32, %arg1: i32) -> (i32, i32) {
    %c0_i32 = arith.constant 0 : i32
    return %arg0, %arg1 : i32, i32
  }
}

</mosaic_0001>

<bundles_post_ra>
// kernel: bert_generation_lm_head_prepared.1
= control target key start
LH: loop header
LB: loop body
LE: loop exit
PB: predicated region body
PF: predicated region fallthrough
CT: control target
= control target key end

     0   :  { %8 = vsyncpa [#allocation3], 0  ;;  %s248_s12 = smov [#allocation2]   ;;  %s298_s0 = inlined_call_operand.vmem [shape: f32[16,128], index: 0, kind: input, shape index: {}]   ;;  %s299_s1 = inlined_call_operand.hbm [shape: f32[128,128], index: 1, kind: input, shape index: {}]   ;;  %s300_s2 = inlined_call_operand.vmem [shape: f32[1,128], index: 2, kind: input, shape index: {}]   ;;  %s301_s3 = inlined_call_operand.vmem [shape: f32[16,128], index: 3, kind: output, shape index: {}]  }
   0x1   :  { %s16_s13 = sshll.u32 %s248_s12, 4  ;;  %s224_s16 = scalar_lea.hbm %s299_s1, 2048  ;;  %s17_s13 = int_to_ptr.vmem [resolvable:$true] %s16_s13 }
   0x2   :  { %p225_p0 = scmp.ne.s32.totalorder %s299_s1, %s224_s16  ;;  %p228_p1 = scmp.lt.u32.totalorder %s224_s16, %s299_s1 }
   0x4   :  { %p230_p2 = pnand %p228_p1, %p225_p0 }
   0x6   :  { %233 = shalt.err (!%p230_p2)
}
   0x7   :  { %s234_s21 = scalar_lea.vmem %s17_s13, 2048  ;;  %p239_p4 = scmp.lt.s32.totalorder %s17_s13, %s17_s13 }
   0x8   :  { %p235_p3 = scmp.ne.s32.totalorder %s17_s13, %s234_s21  ;;  %p240_p5 = scmp.lt.s32.totalorder %s234_s21, %s234_s21 }
   0xa   :  { %p241_p6 = por %p240_p5, %p239_p4 }
   0xc   :  { %p242_p7 = pnand %p241_p6, %p235_p3 }
   0xe   :  { %245 = shalt.err (!%p242_p7)
}
   0xf   :  { %s249_s22 = smov 128   ;;  %s250_s23 = smov 8  }
  0x10   :  { %22 = dma.hbm_to_vmem [thread:$0]  %s299_s1, 2048, %s17_s13, [#allocation3], %s249_s22, %s249_s22, %s250_s23  }
  0x11   :  { %246 = dma.done.wait [#allocation3], 2048  }
  0x12   :  { %247 = vsyncadd [#allocation3], 4294965248  ;;  %v30_v0 = vld [vmem:[#allocation2] sm:$0xff]  ;;  %v31_v1 = vld [vmem:[#allocation2 + $0x8] sm:$0xff] }
  0x13   :  { %v32_v2 = vld [vmem:[#allocation2 + $0x10] sm:$0xff]  ;;  %v189_v3 = vpack.c.bf16 %v31_v1, %v30_v0  ;;  %v33_v4 = vld [vmem:[#allocation2 + $0x18] sm:$0xff]  ;;  %v34_v6 = vld [vmem:[#allocation2 + $0x20] sm:$0xff] }
  0x14   :  { %v193_v5 = vpack.c.bf16 %v33_v4, %v32_v2  ;;  %v35_v7 = vld [vmem:[#allocation2 + $0x28] sm:$0xff]  ;;  %v28_v9 = vld [vmem:[%s298_s0] sm:$0xff]  ;;  %v36_v10 = vld [vmem:[#allocation2 + $0x30] sm:$0xff] }
  0x15   :  { %190 = vmatprep.subr.bf16.mxu0 %v189_v3  ;;  %v197_v8 = vpack.c.bf16 %v35_v7, %v34_v6  ;;  %v37_v11 = vld [vmem:[#allocation2 + $0x38] sm:$0xff]  ;;  %186 = vmatprep.mubr.f32.mxu0 %v28_v9  ;;  %v38_v13 = vld [vmem:[#allocation2 + $0x40] sm:$0xff]  ;;  %v39_v14 = vld [vmem:[#allocation2 + $0x48] sm:$0xff] }
  0x16   :  { %192 = vmatpush3.bf16.msra.mxu0 %v189_v3  ;;  %v201_v12 = vpack.c.bf16 %v37_v11, %v36_v10  ;;  %v205_v15 = vpack.c.bf16 %v39_v14, %v38_v13  ;;  %v40_v16 = vld [vmem:[#allocation2 + $0x50] sm:$0xff]  ;;  %v41_v17 = vld [vmem:[#allocation2 + $0x58] sm:$0xff]  ;;  %v42_v19 = vld [vmem:[#allocation2 + $0x60] sm:$0xff] }
  0x17   :  { %194 = vmatprep.subr.bf16.mxu0 %v193_v5  ;;  %v209_v18 = vpack.c.bf16 %v41_v17, %v40_v16  ;;  %v43_v20 = vld [vmem:[#allocation2 + $0x68] sm:$0xff]  ;;  %v44_v22 = vld [vmem:[#allocation2 + $0x70] sm:$0xff]  ;;  %v45_v23 = vld [vmem:[#allocation2 + $0x78] sm:$0xff] }
  0x18   :  { %v213_v21 = vpack.c.bf16 %v43_v20, %v42_v19  ;;  %v217_v24 = vpack.c.bf16 %v45_v23, %v44_v22  ;;  %v29_v25 = vld [vmem:[%s298_s0 + $0x8] sm:$0xff]  ;;  %v135_v26 = vld [vmem:[%s300_s2] ss:$0 sm:$0xff] }
  0x1a   :  { %196 = vmatpush3.bf16.msra.mxu0 %v193_v5 }
  0x1b   :  { %198 = vmatprep.subr.bf16.mxu0 %v197_v8 }
  0x1e   :  { %200 = vmatpush3.bf16.msra.mxu0 %v197_v8 }
  0x1f   :  { %202 = vmatprep.subr.bf16.mxu0 %v201_v12 }
  0x22   :  { %204 = vmatpush3.bf16.msra.mxu0 %v201_v12 }
  0x23   :  { %206 = vmatprep.subr.bf16.mxu0 %v205_v15 }
  0x26   :  { %208 = vmatpush3.bf16.msra.mxu0 %v205_v15 }
  0x27   :  { %210 = vmatprep.subr.bf16.mxu0 %v209_v18 }
  0x2a   :  { %212 = vmatpush3.bf16.msra.mxu0 %v209_v18 }
  0x2b   :  { %214 = vmatprep.subr.bf16.mxu0 %v213_v21 }
  0x2e   :  { %216 = vmatpush3.bf16.msra.mxu0 %v213_v21 }
  0x2f   :  { %218 = vmatprep.subr.bf16.mxu0 %v217_v24 }
  0x32   :  { %220 = vmatpush3.bf16.msra.mxu0 %v217_v24 }
  0x35   :  { %187 = vmatmul.mubr.f32.vlgmr.msra.gmra.mrb[0].mxu0 %v29_v25 }
 0x108   :  { %v188_v27 = vpop.f32.mrb[0].mxu0 }
 0x109   :  { %v125_v28 = vadd.f32 %v188_v27, %v135_v26  ;;  %v119_v29 = vpop.f32.mrb[1].mxu0 }
 0x10a   :  { %v120_v30 = vadd.f32 %v135_v26, %v119_v29 }
 0x10b   :  { %129 = vst [vmem:[%s301_s3 + $0x8] sm:$0xff] %v125_v28 }
 0x10c   :  { %128 = vst [vmem:[%s301_s3] sm:$0xff] %v120_v30 }
 0x10d   :  { %134 = vsyncpa [#allocation3], 1 }

</bundles_post_ra>
